<compile_context>
chip_gen: v7x
topology: tpu7x:2x2x1
jax: 0.10.0
libtpu: 0.0.40
codegen_flags: <defaults>
</compile_context>

<pallas_src>
import functools
import math

import jax
import jax.numpy as jnp
from jax.experimental import pallas as pl
from jax.experimental.pallas import tpu as pltpu


# ------------------------------ tiling helpers ------------------------------

def _sublane_multiple(dtype):
    """Sublane packing multiple: 8 for f32, 16 for bf16, 32 for int8."""
    return max(8, 32 // jnp.dtype(dtype).itemsize)


def _round_up(x, m):
    return ((x + m - 1) // m) * m


def _pick_divisor_tile(dim, pref, mult):
    """Largest tile <= pref that divides dim and is a multiple of mult; else full dim."""
    if dim <= pref or dim % mult != 0:
        return dim
    t = (min(pref, dim) // mult) * mult
    while t >= mult:
        if dim % t == 0:
            return t
        t -= mult
    return dim


# ------------------------------ fused FFN kernel ------------------------------

def _ffn_fused_kernel(x_ref, w1_ref, w3_ref, w2_ref, o_ref, acc_ref, *, h_dtype):
    """One (m-tile, hidden-tile) step of the fused SwiGLU FFN.

    x_ref:  (tm, D)  bf16 activation tile (resident across the hidden sweep)
    w1_ref: (D, th)  bf16 gate weight tile  (already (in, out) layout)
    w3_ref: (D, th)  bf16 up   weight tile
    w2_ref: (th, D)  bf16 down weight tile
    o_ref:  (tm, D)  output tile (written on the last hidden step)
    acc_ref:(tm, D)  f32 accumulator for the down projection
    """
    j = pl.program_id(1)

    @pl.when(j == 0)
    def _():
        acc_ref[...] = jnp.zeros_like(acc_ref)

    x = x_ref[...]
    # Gate / up projections for this hidden tile (bf16 MXU, f32 accumulate).
    g = jnp.dot(x, w1_ref[...], preferred_element_type=jnp.float32)
    u = jnp.dot(x, w3_ref[...], preferred_element_type=jnp.float32)
    # SwiGLU epilogue; sigmoid's exp runs on the EUP slot. Cast back to bf16 for the MXU.
    h = (jax.nn.silu(g) * u).astype(h_dtype)
    # Partial down projection: the hidden (j) grid axis is its reduction axis.
    acc_ref[...] += jnp.dot(h, w2_ref[...], preferred_element_type=jnp.float32)

    @pl.when(j == pl.num_programs(1) - 1)
    def _():
        o_ref[...] = acc_ref[...].astype(o_ref.dtype)


def ffn_fused(x2d, w1, w2, w3, *, compute_dtype=jnp.bfloat16, tm_pref=256, th_pref=512):
    """x2d: (M, D); w1, w3: (H, D); w2: (D, H)  (torch nn.Linear layout).

    Returns w2( silu(w1 x) * (w3 x) ) of shape (M, D) in x2d.dtype.
    """
    M, D = x2d.shape
    H = w1.shape[0]
    out_dtype = x2d.dtype

    # One-time relayout + down-cast of the static weights (outside the kernel):
    # present (in, out) so each dot is (tm,K)@(K,tn) with no per-tile XLU transpose.
    w1_t = w1.T.astype(compute_dtype)          # (D, H)
    w3_t = w3.T.astype(compute_dtype)          # (D, H)
    w2_t = w2.T.astype(compute_dtype)          # (H, D)
    xc = x2d.astype(compute_dtype)

    # dtype-aware m tile + padded grid (no "full M" fallback for awkward M = B*S).
    sub = _sublane_multiple(compute_dtype)
    tm = min(_round_up(M, sub), _round_up(tm_pref, sub))
    M_pad = _round_up(M, tm)
    if M_pad != M:
        xc = jnp.pad(xc, ((0, M_pad - M), (0, 0)))
    th = _pick_divisor_tile(H, th_pref, 128)
    grid = (M_pad // tm, H // th)

    c_item = jnp.dtype(compute_dtype).itemsize
    o_item = jnp.dtype(out_dtype).itemsize
    cost = pl.CostEstimate(
        flops=6 * M_pad * D * H + 4 * M_pad * H,
        transcendentals=M_pad * H,
        bytes_accessed=(M_pad * D + grid[0] * 3 * D * H) * c_item + M_pad * D * o_item,
    )
    # Double-buffered block footprint + f32 accumulator; cap at 64 MiB (legal on v7x too).
    vmem_bytes = (2 * (tm * D + 2 * D * th + th * D) * c_item
                  + 2 * tm * D * o_item
                  + tm * D * 4)
    vmem_limit = min(64 * 1024 * 1024, max(32 * 1024 * 1024, int(vmem_bytes * 1.3)))

    y_pad = pl.pallas_call(
        functools.partial(_ffn_fused_kernel, h_dtype=compute_dtype),
        out_shape=jax.ShapeDtypeStruct((M_pad, D), out_dtype),
        grid_spec=pltpu.PrefetchScalarGridSpec(
            num_scalar_prefetch=0,
            grid=grid,
            in_specs=[
                pl.BlockSpec((tm, D), lambda i, j: (i, 0)),   # x (resident across j)
                pl.BlockSpec((D, th), lambda i, j: (0, j)),   # w1^T
                pl.BlockSpec((D, th), lambda i, j: (0, j)),   # w3^T
                pl.BlockSpec((th, D), lambda i, j: (j, 0)),   # w2^T
            ],
            out_specs=pl.BlockSpec((tm, D), lambda i, j: (i, 0)),
            scratch_shapes=[pltpu.VMEM((tm, D), jnp.float32)],
        ),
        compiler_params=pltpu.CompilerParams(
            dimension_semantics=("parallel", "arbitrary"),
            vmem_limit_bytes=vmem_limit,
        ),
        cost_estimate=cost,
    )(xc, w1_t, w3_t, w2_t)
    return y_pad[:M] if M_pad != M else y_pad


# ------------------------------ Module wrapper ------------------------------

def feedforward_forward(x, params, *, compute_dtype=jnp.bfloat16, tm_pref=256, th_pref=512):
    """Matches FeedForward.forward: dropout(w2(silu(w1(x)) * w3(x))), eval / dropout=0."""
    B, S, D = x.shape
    y = ffn_fused(x.reshape(B * S, D), params["w1"], params["w2"], params["w3"],
                  compute_dtype=compute_dtype, tm_pref=tm_pref, th_pref=th_pref)
    # nn.Dropout(p=0.0) / eval mode is the identity -> intentionally not emitted.
    return y.reshape(B, S, D)


# ------------------------------ Pure-JAX reference ------------------------------

def feedforward_reference(x, params, compute_dtype=jnp.bfloat16):
    """Same math as the kernel (bf16 MXU operands, f32 accumulation)."""
    B, S, D = x.shape
    xc = x.reshape(B * S, D).astype(compute_dtype)
    w1 = params["w1"].astype(compute_dtype)
    w3 = params["w3"].astype(compute_dtype)
    w2 = params["w2"].astype(compute_dtype)
    g = jnp.dot(xc, w1.T, preferred_element_type=jnp.float32)
    u = jnp.dot(xc, w3.T, preferred_element_type=jnp.float32)
    h = (jax.nn.silu(g) * u).astype(compute_dtype)
    y = jnp.dot(h, w2.T, preferred_element_type=jnp.float32)
    return y.astype(x.dtype).reshape(B, S, D)


# ------------------------------------ Main ------------------------------------

if __name__ == "__main__":
    def make_case(key, B, S, dim, multiple_of, hidden_dim=None):
        if hidden_dim is None:
            hidden_dim = 4 * dim
            hidden_dim = int(2 * hidden_dim / 3)
            hidden_dim = multiple_of * ((hidden_dim + multiple_of - 1) // multiple_of)
        k_x, k1, k2, k3 = jax.random.split(key, 4)
        x = jax.random.normal(k_x, (B, S, dim), jnp.float32)
        params = {
            # torch nn.Linear weight layout: (out_features, in_features), no bias.
            "w1": jax.random.normal(k1, (hidden_dim, dim), jnp.float32) / math.sqrt(dim),
            "w2": jax.random.normal(k2, (dim, hidden_dim), jnp.float32) / math.sqrt(hidden_dim),
            "w3": jax.random.normal(k3, (hidden_dim, dim), jnp.float32) / math.sqrt(dim),
        }
        return x, params

    key = jax.random.PRNGKey(0)
    k_a, k_b = jax.random.split(key)

    # Case 1: module defaults at small shape (dim=32, multiple_of=32 -> hidden=96).
    # Degenerates to a single grid step (full-dim blocks).
    x_a, p_a = make_case(k_a, B=2, S=8, dim=32, multiple_of=32)
    out_a = jax.block_until_ready(feedforward_forward(x_a, p_a))
    ref_a = feedforward_reference(x_a, p_a)
    assert out_a.shape == x_a.shape
    assert jnp.allclose(out_a, ref_a, atol=2e-2, rtol=2e-2), "case 1 mismatch vs reference"

    # Case 2: shapes that exercise the tiled / multi-step reduction path
    # (dim=256, multiple_of=256 -> hidden=768; grid = (2 m-tiles, 3 hidden-tiles)).
    x_b, p_b = make_case(k_b, B=2, S=64, dim=256, multiple_of=256)
    out_b = jax.block_until_ready(
        feedforward_forward(x_b, p_b, tm_pref=64, th_pref=256))
    ref_b = feedforward_reference(x_b, p_b)
    assert out_b.shape == x_b.shape
    assert jnp.allclose(out_b, ref_b, atol=2e-2, rtol=2e-2), "case 2 mismatch vs reference"

    print("KERNEL_OK")
</pallas_src>

<mosaic_0001>
module attributes {stable_mosaic.version = 11 : i64} {
  func.func @_ffn_fused_kernel(%arg0: i32, %arg1: i32, %arg2: memref<16x32xbf16, #tpu.memory_space<vmem>>, %arg3: memref<32x96xbf16, #tpu.memory_space<vmem>>, %arg4: memref<32x96xbf16, #tpu.memory_space<vmem>>, %arg5: memref<96x32xbf16, #tpu.memory_space<vmem>>, %arg6: memref<16x32xf32, #tpu.memory_space<vmem>>, %arg7: memref<16x32xf32, #tpu.memory_space<vmem>>) attributes {dimension_semantics = [#tpu.dimension_semantics<parallel>, #tpu.dimension_semantics<arbitrary>], iteration_bounds = array<i64: 1, 1>, scalar_prefetch = 0 : i64, scratch_operands = 1 : i64, tpu.core_type = #tpu.core_type<tc>, window_params = [{transform_indices = @transform_0, window_bounds = array<i64: 16, 32>}, {transform_indices = @transform_1, window_bounds = array<i64: 32, 96>}, {transform_indices = @transform_2, window_bounds = array<i64: 32, 96>}, {transform_indices = @transform_3, window_bounds = array<i64: 96, 32>}, {transform_indices = @transform_4, window_bounds = array<i64: 16, 32>}]} {
    %c0_i32 = arith.constant 0 : i32
    %0 = arith.cmpi eq, %arg1, %c0_i32 : i32
    %1 = arith.extui %0 : i1 to i32
    %c0_i32_0 = arith.constant 0 : i32
    %2 = arith.cmpi ne, %1, %c0_i32_0 : i32
    scf.if %2 {
      %cst_17 = arith.constant 0.000000e+00 : f32
      %24 = vector.broadcast %cst_17 : f32 to vector<16x32xf32>
      %c0_18 = arith.constant 0 : index
      %c0_19 = arith.constant 0 : index
      %25 = vector.load %arg7[%c0_18, %c0_19] : memref<16x32xf32, #tpu.memory_space<vmem>>, vector<16x32xf32>
      tpu.vector_store %arg7[%c0_18, %c0_19], %24 {strides = array<i32>} : memref<16x32xf32, #tpu.memory_space<vmem>>, vector<16x32xf32>,
    } else {
    }
    %c0 = arith.constant 0 : index
    %c0_1 = arith.constant 0 : index
    %3 = vector.load %arg2[%c0, %c0_1] : memref<16x32xbf16, #tpu.memory_space<vmem>>, vector<16x32xbf16>
    %c0_2 = arith.constant 0 : index
    %c0_3 = arith.constant 0 : index
    %4 = vector.load %arg3[%c0_2, %c0_3] : memref<32x96xbf16, #tpu.memory_space<vmem>>, vector<32x96xbf16>
    %cst = arith.constant dense<0.000000e+00> : vector<16x96xf32>
    %5 = tpu.matmul %3, %4, %cst {dimension_numbers = #tpu.dot_dimension_numbers<[1], [0], [0], [1], [0, 0, 1, 1], [], []>} : vector<16x32xbf16>, vector<32x96xbf16>, vector<16x96xf32> -> vector<16x96xf32>
    %c0_4 = arith.constant 0 : index
    %c0_5 = arith.constant 0 : index
    %6 = vector.load %arg4[%c0_4, %c0_5] : memref<32x96xbf16, #tpu.memory_space<vmem>>, vector<32x96xbf16>
    %cst_6 = arith.constant dense<0.000000e+00> : vector<16x96xf32>
    %7 = tpu.matmul %3, %6, %cst_6 {dimension_numbers = #tpu.dot_dimension_numbers<[1], [0], [0], [1], [0, 0, 1, 1], [], []>} : vector<16x32xbf16>, vector<32x96xbf16>, vector<16x96xf32> -> vector<16x96xf32>
    %8 = arith.negf %5 : vector<16x96xf32>
    %9 = math.exp %8 : vector<16x96xf32>
    %cst_7 = arith.constant 1.000000e+00 : f32
    %10 = vector.broadcast %cst_7 : f32 to vector<16x96xf32>
    %11 = arith.addf %10, %9 : vector<16x96xf32>
    %12 = arith.divf %10, %11 : vector<16x96xf32>
    %13 = arith.mulf %5, %12 : vector<16x96xf32>
    %14 = arith.mulf %13, %7 : vector<16x96xf32>
    %15 = arith.truncf %14 : vector<16x96xf32> to vector<16x96xbf16>
    %c0_8 = arith.constant 0 : index
    %c0_9 = arith.constant 0 : index
    %16 = vector.load %arg7[%c0_8, %c0_9] : memref<16x32xf32, #tpu.memory_space<vmem>>, vector<16x32xf32>
    %c0_10 = arith.constant 0 : index
    %c0_11 = arith.constant 0 : index
    %17 = vector.load %arg5[%c0_10, %c0_11] : memref<96x32xbf16, #tpu.memory_space<vmem>>, vector<96x32xbf16>
    %cst_12 = arith.constant dense<0.000000e+00> : vector<16x32xf32>
    %18 = tpu.matmul %15, %17, %cst_12 {dimension_numbers = #tpu.dot_dimension_numbers<[1], [0], [0], [1], [0, 0, 1, 1], [], []>} : vector<16x96xbf16>, vector<96x32xbf16>, vector<16x32xf32> -> vector<16x32xf32>
    %19 = arith.addf %16, %18 : vector<16x32xf32>
    %c0_13 = arith.constant 0 : index
    %c0_14 = arith.constant 0 : index
    %20 = vector.load %arg7[%c0_13, %c0_14] : memref<16x32xf32, #tpu.memory_space<vmem>>, vector<16x32xf32>
    tpu.vector_store %arg7[%c0_13, %c0_14], %19 {strides = array<i32>} : memref<16x32xf32, #tpu.memory_space<vmem>>, vector<16x32xf32>,
    %c0_i32_15 = arith.constant 0 : i32
    %21 = arith.cmpi eq, %arg1, %c0_i32_15 : i32
    %22 = arith.extui %21 : i1 to i32
    %c0_i32_16 = arith.constant 0 : i32
    %23 = arith.cmpi ne, %22, %c0_i32_16 : i32
    scf.if %23 {
      %c0_17 = arith.constant 0 : index
      %c0_18 = arith.constant 0 : index
      %24 = vector.load %arg7[%c0_17, %c0_18] : memref<16x32xf32, #tpu.memory_space<vmem>>, vector<16x32xf32>
      %c0_19 = arith.constant 0 : index
      %c0_20 = arith.constant 0 : index
      %25 = vector.load %arg6[%c0_19, %c0_20] : memref<16x32xf32, #tpu.memory_space<vmem>>, vector<16x32xf32>
      tpu.vector_store %arg6[%c0_19, %c0_20], %24 {strides = array<i32>} : memref<16x32xf32, #tpu.memory_space<vmem>>, vector<16x32xf32>,
    } else {
    }
    return
  }
  func.func @transform_0(%arg0: i32, %arg1: i32) -> (i32, i32) {
    %c0_i32 = arith.constant 0 : i32
    %c0_i32_0 = arith.constant 0 : i32
    return %arg0, %c0_i32 : i32, i32
  }
  func.func @transform_1(%arg0: i32, %arg1: i32) -> (i32, i32) {
    %c0_i32 = arith.constant 0 : i32
    %c0_i32_0 = arith.constant 0 : i32
    return %c0_i32, %arg1 : i32, i32
  }
  func.func @transform_2(%arg0: i32, %arg1: i32) -> (i32, i32) {
    %c0_i32 = arith.constant 0 : i32
    %c0_i32_0 = arith.constant 0 : i32
    return %c0_i32, %arg1 : i32, i32
  }
  func.func @transform_3(%arg0: i32, %arg1: i32) -> (i32, i32) {
    %c0_i32 = arith.constant 0 : i32
    %c0_i32_0 = arith.constant 0 : i32
    return %arg1, %c0_i32 : i32, i32
  }
  func.func @transform_4(%arg0: i32, %arg1: i32) -> (i32, i32) {
    %c0_i32 = arith.constant 0 : i32
    %c0_i32_0 = arith.constant 0 : i32
    return %arg0, %c0_i32 : i32, i32
  }
}

</mosaic_0001>

<bundles_post_ra>
// kernel: tpu_custom_call.1
= control target key start
LH: loop header
LB: loop body
LE: loop exit
PB: predicated region body
PF: predicated region fallthrough
CT: control target
= control target key end

     0   :  { %v399_v1 = vmov 0.0   ;;  %vm400_vm0 = vmmov 0   ;;  %vm23_vm1 = vcmask 261120   ;;  %s482_s0 = inlined_call_operand.vmem [shape: bf16[16,32], index: 0, kind: input, shape index: {}]   ;;  %s483_s1 = inlined_call_operand.vmem [shape: bf16[32,96], index: 1, kind: input, shape index: {}]   ;;  %s484_s2 = inlined_call_operand.vmem [shape: bf16[32,96], index: 2, kind: input, shape index: {}]   ;;  %s485_s3 = inlined_call_operand.vmem [shape: bf16[96,32], index: 3, kind: input, shape index: {}]   ;;  %s486_s4 = inlined_call_operand.hbm [shape: f32[16,32], index: 4, kind: output, shape index: {}]  }
   0x1   :  { %v356_v0 = vld [vmem:[%s483_s1] sm:$0xff]   ;;  %319 = vmatprep.subr.bf16.mxu1 %v399_v1  ;;  %335 = vmatprep.subr.bf16.mxu0 %v399_v1  ;;  %v357_v2 = vld [vmem:[%s483_s1 + $0x8] sm:$0xff]   ;;  %24 = vst.msk [vmem:[#allocation2] sm:$0xff] %vm23_vm1, %v399_v1  ;;  %25 = vst.msk [vmem:[#allocation2 + $0x8] sm:$0xff] %vm23_vm1, %v399_v1 }
   0x2   :  { %320 = vmatpush3.bf16.msra.mxu1 %v356_v0  ;;  %323 = vmatprep.mubr.msk.bf16.mxu1 %vm400_vm0, %v399_v1  ;;  %v358_v3 = vld [vmem:[%s482_s0] sm:$0xff]  }
   0x3   :  { %321 = vmatprep.subr.bf16.mxu1 %v399_v1  ;;  %347 = vmatprep.mubr.msk.bf16.mxu0 %vm400_vm0, %v399_v1  ;;  %v359_v4 = vld [vmem:[%s484_s2] sm:$0xff]  }
   0x6   :  { %322 = vmatpush3.bf16.msra.mxu1 %v357_v2 }
   0x7   :  { %327 = vmatprep.subr.bf16.mxu1 %v399_v1 }
   0x9   :  { %324 = vmatmul.mubr.msk.bf16.vlgmr.msra.gmra.mrb[0].mxu1 %vm23_vm1, %v358_v3 }
   0xa   :  { %9 = vsyncpa [#allocation4], 0  ;;  %328 = vmatpush3.bf16.msra.mxu1 %v359_v4  ;;  %v360_v5 = vld [vmem:[%s484_s2 + $0x8] sm:$0xff]   ;;  %331 = vmatprep.mubr.msk.bf16.mxu1 %vm400_vm0, %v399_v1  ;;  %v361_v6 = vld [vmem:[%s485_s3] sm:$0xff]   ;;  %vm218_vm2 = vcmask 785408  }
   0xb   :  { %329 = vmatprep.subr.bf16.mxu1 %v399_v1  ;;  %336 = vmatpush3.bf16.msra.mxu0 %v361_v6  ;;  %v362_v7 = vld [vmem:[%s485_s3 + $0x8] sm:$0xff]   ;;  %v363_v8 = vld [vmem:[%s485_s3 + $0x10] sm:$0xff]   ;;  %v364_v9 = vld [vmem:[%s485_s3 + $0x18] sm:$0xff]  }
   0xc   :  { %337 = vmatprep.subr.bf16.mxu0 %v399_v1  ;;  %v365_v10 = vld [vmem:[%s485_s3 + $0x20] sm:$0xff]   ;;  %v366_v11 = vld [vmem:[%s485_s3 + $0x28] sm:$0xff]   ;;  %s401_s3 = smov [#allocation3]  }
   0xd   :  { %v168_v33 = vld [vmem:[#allocation2] sm:$0xff]  ;;  %v169_v35 = vld [vmem:[#allocation2 + $0x8] sm:$0xff]  ;;  %s279_s8 = sshll.u32 %s401_s3, 4  ;;  %s280_s8 = int_to_ptr.vmem [resolvable:$true] %s279_s8 }
   0xe   :  { %330 = vmatpush3.bf16.msra.mxu1 %v360_v5  ;;  %s375_s9 = scalar_lea.vmem %s280_s8, 256  ;;  %p380_p1 = scmp.lt.s32.totalorder %s280_s8, %s280_s8 }
   0xf   :  { %338 = vmatpush3.bf16.msra.mxu0 %v362_v7  ;;  %p376_p0 = scmp.ne.s32.totalorder %s280_s8, %s375_s9  ;;  %p381_p2 = scmp.lt.s32.totalorder %s375_s9, %s375_s9 }
  0x10   :  { %339 = vmatprep.subr.bf16.mxu0 %v399_v1 }
  0x11   :  { %332 = vmatmul.mubr.msk.bf16.vlgmr.msra.gmra.mrb[4].mxu1 %vm23_vm1, %v358_v3  ;;  %p382_p3 = por %p381_p2, %p380_p1 }
  0x13   :  { %340 = vmatpush3.bf16.msra.mxu0 %v363_v8  ;;  %p383_p4 = pnand %p382_p3, %p376_p0 }
  0x14   :  { %341 = vmatprep.subr.bf16.mxu0 %v399_v1 }
  0x17   :  { %342 = vmatpush3.bf16.msra.mxu0 %v364_v9 }
  0x18   :  { %343 = vmatprep.subr.bf16.mxu0 %v399_v1 }
  0x1b   :  { %344 = vmatpush3.bf16.msra.mxu0 %v365_v10 }
  0x1c   :  { %345 = vmatprep.subr.bf16.mxu0 %v399_v1 }
  0x1f   :  { %346 = vmatpush3.bf16.msra.mxu0 %v366_v11 }
  0xdc   :  { %v87_v12 = vpop.f32.mrb[0].mxu1 }
  0xdd   :  { %v297_v13 = vmul.f32 -1.442695, %v87_v12  ;;  %v325_v14 = vpop.f32.mrb[1].mxu1 }
  0xde   :  { %v90_v15 = vpop.f32.mrb[2].mxu1 }
  0xdf   :  { %367 = vpow2.f32 %v297_v13  ;;  %v298_v16 = vmul.f32 -1.442695, %v90_v15  ;;  %v326_v17 = vpop.f32.mrb[3].mxu1 }
  0xe1   :  { %369 = vpow2.f32 %v298_v16 }
  0xe4   :  { %v144_v18 = vpop.f32.mrb[4].mxu1 }
  0xe5   :  { %v333_v19 = vpop.f32.mrb[5].mxu1 }
  0xe6   :  { %v147_v20 = vpop.f32.mrb[6].mxu1 }
  0xe7   :  { %v334_v21 = vpop.f32.mrb[7].mxu1 }
  0xe9   :  { %v368_v22 = vpop.eup %367 }
  0xea   :  { %v157_v23 = vadd.f32 1.0, %v368_v22 }
  0xeb   :  { %v370_v24 = vpop.eup %369 }
  0xec   :  { %371 = vrcp.f32 %v157_v23  ;;  %v158_v25 = vadd.f32 1.0, %v370_v24 }
  0xee   :  { %373 = vrcp.f32 %v158_v25 }
  0xf6   :  { %v372_v26 = vpop.eup %371 }
  0xf7   :  { %v163_v27 = vmul.f32 %v372_v26, %v87_v12 }
  0xf8   :  { %v374_v28 = vpop.eup %373 }
  0xf9   :  { %v164_v29 = vmul.f32 %v374_v28, %v90_v15  ;;  %v165_v30 = vmul.f32 %v163_v27, %v144_v18 }
  0xfb   :  { %v166_v31 = vmul.f32 %v164_v29, %v147_v20 }
  0xfd   :  { %v167_v32 = vpack.c.bf16 %v166_v31, %v165_v30 }
  0xff   :  { %348 = vmatmul.mubr.msk.bf16.vlgmr.msra.gmra.mrb[0].mxu0 %vm218_vm2, %v167_v32 }
 0x1d2   :  { %v256_v34 = vpop.f32.mrb[0].mxu0 }
 0x1d3   :  { %v263_v36 = vadd.f32 %v256_v34, %v168_v33  ;;  %v349_v37 = vpop.f32.mrb[1].mxu0 }
 0x1d4   :  { %v259_v38 = vpop.f32.mrb[2].mxu0 }
 0x1d5   :  { %265 = vst.msk [vmem:[#allocation2] sm:$0xff] %vm23_vm1, %v263_v36  ;;  %v264_v39 = vadd.f32 %v259_v38, %v169_v35  ;;  %v350_v40 = vpop.f32.mrb[3].mxu0 }
 0x1d7   :  { %266 = vst.msk [vmem:[#allocation2 + $0x8] sm:$0xff] %vm23_vm1, %v264_v39 }
 0x1dc   :  { %v270_v41 = vld [vmem:[#allocation2] sm:$0xff] }
 0x1dd   :  { %272 = vst.msk [vmem:[#allocation3] sm:$0xff] %vm23_vm1, %v270_v41 }
 0x1de   :  { %v271_v42 = vld [vmem:[#allocation2 + $0x8] sm:$0xff] }
 0x1df   :  { %273 = vst.msk [vmem:[#allocation3 + $0x8] sm:$0xff] %vm23_vm1, %v271_v42 }
 0x1e0   :  { %386 = shalt.err (!%p383_p4)
}
 0x1e1   :  { %s387_s12 = scalar_lea.hbm %s486_s4, 256 }
 0x1e2   :  { %p388_p5 = scmp.ne.s32.totalorder %s486_s4, %s387_s12  ;;  %p391_p6 = scmp.lt.u32.totalorder %s387_s12, %s486_s4 }
 0x1e4   :  { %p393_p7 = pnand %p391_p6, %p388_p5 }
 0x1e6   :  { %396 = shalt.err (!%p393_p7)
}
 0x1e7   :  { %s402_s17 = smov 128   ;;  %s403_s18 = smov 8  }
 0x1e8   :  { %285 = dma.vmem_to_hbm [thread:$0]  %s280_s8, 256, %s486_s4, [#allocation4], %s402_s17, %s402_s17, %s403_s18  }
 0x1e9   :  { %397 = dma.done.wait [#allocation4], 256  }
 0x1ea   :  { %398 = vsyncadd [#allocation4], 4294967040 }
 0x1eb   :  { %289 = vsyncpa [#allocation4], 1 }

</bundles_post_ra>
